<compile_context>
chip_gen: v6e
topology: v6e:2x2x1
jax: 0.10.0
libtpu: 0.0.40
codegen_flags: <defaults>
</compile_context>

<pallas_src>
import numpy as np
import jax
import jax.numpy as jnp
from jax import lax
from jax.experimental import pallas as pl
from jax.experimental.pallas import tpu as pltpu


# ---------------------------------------------------------------------------
# Pallas kernel: tiled channel-concat of data tensor with alpha feature maps.
# ---------------------------------------------------------------------------
def concat_kernel(x_ref, a_ref, o_ref):
    """x_ref: (1, C, T)   data-channel tile for one batch row
       a_ref: (K, T)      alpha-map tile (shared by every batch row -> .repeat(b,1))
       o_ref: (1, C+K, T) output tile (concat along channels)"""
    C = x_ref.shape[1]
    # Lane axis (T) is a dense multiple of 128; the channel split only masks a few
    # sublanes, which is negligible for this mem-bound copy.
    o_ref[:, :C, :] = x_ref[...]
    o_ref[:, C:, :] = a_ref[...][None].astype(o_ref.dtype)


# ---------------------------------------------------------------------------
# Alpha branch (hoisted out of the kernel): closed-form transposed convs.
# ---------------------------------------------------------------------------
def _alpha_feature_maps(alpha, w1, w2, H, W):
    """relu(convT1(alpha)) -> relu(convT2(.)) -> nearest Upsample, as tiny matmuls.

    Returns the [K, H*W] alpha maps (batch independent)."""
    w1_np = np.asarray(w1, np.float32)  # [Cin=K, Cout=K, 4, 4]
    w2_np = np.asarray(w2, np.float32)  # [Cin=K, Cout=K, 6, 6]
    K = w1_np.shape[0]

    # ConvT1 on a 1x1 input is a pure matmul: alpha[K] -> h1[K*4*4], layout (co, ih, iw).
    M1 = w1_np.reshape(K, K * 16)

    # Compact dense matrix of ConvT2 (stride=2, padding=1): (ci, ih, iw) -> (co, oh, ow)
    # on the true 10x10 output grid (does NOT scale with H*W).
    C2 = np.zeros((K, 4, 4, K, 10, 10), np.float32)
    for ih in range(4):
        for iw in range(4):
            for kh in range(6):
                for kw in range(6):
                    oh, ow = ih * 2 - 1 + kh, iw * 2 - 1 + kw
                    if 0 <= oh < 10 and 0 <= ow < 10:
                        C2[:, ih, iw, :, oh, ow] += w2_np[:, :, kh, kw]
    M2 = C2.reshape(K * 16, K * 100)

    a = alpha.reshape(1, K).astype(jnp.float32)
    h1 = jnp.maximum(jnp.dot(a, jnp.asarray(M1), precision=lax.Precision.HIGHEST), 0.0)
    a10 = jnp.maximum(jnp.dot(h1, jnp.asarray(M2), precision=lax.Precision.HIGHEST), 0.0)
    a10 = a10.reshape(K, 10, 10)

    # nn.Upsample(size=(H, W)), default mode='nearest': src = floor(dst * 10 / out)
    rows = (np.arange(H) * 10) // H
    cols = (np.arange(W) * 10) // W
    return a10[:, rows][:, :, cols].reshape(K, H * W)


def _pick_tile_hw(hw, target=512):
    """Largest multiple-of-128 divisor of hw that is <= target (else full extent)."""
    if hw % 128 != 0:
        return hw
    t = min(target, hw)
    t -= t % 128
    while t > 128 and hw % t != 0:
        t -= 128
    return t if hw % t == 0 else hw


# ---------------------------------------------------------------------------
# Wrapper
# ---------------------------------------------------------------------------
def upsampler_forward(x, alpha, w1, w2):
    """x: [B, C, H, W], alpha: [K], w1: [K, K, 4, 4], w2: [K, K, 6, 6]."""
    B, C, H, W = x.shape
    K = alpha.shape[0]
    HW = H * W

    amap = _alpha_feature_maps(alpha, w1, w2, H, W).astype(x.dtype)  # [K, HW]
    x_flat = x.reshape(B, C, HW)                                     # native dtype

    T = _pick_tile_hw(HW)
    n_t = HW // T

    out_flat = pl.pallas_call(
        concat_kernel,
        out_shape=jax.ShapeDtypeStruct((B, C + K, HW), x.dtype),
        # HW tile outer, batch inner: amap block index is constant across the inner
        # batch steps, so the same VMEM block is reused without a re-fetch.
        grid=(n_t, B),
        in_specs=[
            pl.BlockSpec((1, C, T), lambda t, b: (b, 0, t)),
            pl.BlockSpec((K, T), lambda t, b: (0, t)),
        ],
        out_specs=pl.BlockSpec((1, C + K, T), lambda t, b: (b, 0, t)),
        compiler_params=pltpu.CompilerParams(
            dimension_semantics=("parallel", "parallel")),
    )(x_flat, amap)

    out = out_flat.reshape(B, C + K, H, W)
    # TODO(synk): `child_model` is an external submodule of the original code; treated as identity here.
    # TODO(synk): tabular (len(input_dim)==1) branch is a trivial feature concat and is not kernelized.
    return out


# ---------------------------------------------------------------------------
# Independent (loop-based) reference of the alpha branch, for verification.
# ---------------------------------------------------------------------------
def _reference_alpha_branch(alpha, w1, w2, H, W):
    K = alpha.shape[0]
    a1 = np.zeros((K, 4, 4), np.float32)
    for co in range(K):
        for ci in range(K):
            a1[co] += alpha[ci] * w1[ci, co]
    a1 = np.maximum(a1, 0.0)
    a2 = np.zeros((K, 10, 10), np.float32)
    for co in range(K):
        for ci in range(K):
            for ih in range(4):
                for iw in range(4):
                    for kh in range(6):
                        for kw in range(6):
                            oh, ow = ih * 2 - 1 + kh, iw * 2 - 1 + kw
                            if 0 <= oh < 10 and 0 <= ow < 10:
                                a2[co, oh, ow] += a1[ci, ih, iw] * w2[ci, co, kh, kw]
    a2 = np.maximum(a2, 0.0)
    rows = (np.arange(H) * 10) // H
    cols = (np.arange(W) * 10) // W
    return a2[:, rows][:, :, cols]  # [K, H, W]


if __name__ == "__main__":
    key = jax.random.PRNGKey(0)
    k1, k2, k3, k4 = jax.random.split(key, 4)

    B, C, H, W = 2, 3, 32, 32   # input_dim = (3, 32, 32) -> image branch
    K = 3                        # number of objectives / ray dimension

    x = jax.random.normal(k1, (B, C, H, W), dtype=jnp.float32)
    alpha = jax.nn.softmax(jax.random.normal(k2, (K,), dtype=jnp.float32))  # sampled ray
    # Deterministic synthetic weights (same shapes as nn.ConvTranspose2d, bias=False).
    w1 = jax.random.normal(k3, (K, K, 4, 4), dtype=jnp.float32) * 0.25
    w2 = jax.random.normal(k4, (K, K, 6, 6), dtype=jnp.float32) * 0.10

    out = jax.block_until_ready(upsampler_forward(x, alpha, w1, w2))

    assert out.shape == (B, C + K, H, W)
    # Pass-through channels must equal x exactly.
    assert bool(jnp.allclose(out[:, :C], x)), "data pass-through mismatch"
    # Alpha channels vs an independent loop reference of the transposed CNN + upsample.
    ref = _reference_alpha_branch(np.asarray(alpha), np.asarray(w1), np.asarray(w2), H, W)
    got = np.asarray(out[:, C:])
    assert np.allclose(got, np.broadcast_to(ref, (B, K, H, W)), atol=1e-4, rtol=1e-4), \
        "alpha-branch mismatch"
    print("KERNEL_OK")
</pallas_src>

<mosaic_0001>
module attributes {stable_mosaic.version = 11 : i64} {
  func.func @concat_kernel(%arg0: i32, %arg1: i32, %arg2: memref<1x3x512xf32, #tpu.memory_space<vmem>>, %arg3: memref<3x512xf32, #tpu.memory_space<vmem>>, %arg4: memref<1x6x512xf32, #tpu.memory_space<vmem>>) attributes {dimension_semantics = [#tpu.dimension_semantics<parallel>, #tpu.dimension_semantics<parallel>], iteration_bounds = array<i64: 2, 2>, scalar_prefetch = 0 : i64, scratch_operands = 0 : i64, tpu.core_type = #tpu.core_type<tc>, window_params = [{transform_indices = @transform_0, window_bounds = array<i64: 1, 3, 512>}, {transform_indices = @transform_1, window_bounds = array<i64: 3, 512>}, {transform_indices = @transform_2, window_bounds = array<i64: 1, 6, 512>}]} {
    %c0 = arith.constant 0 : index
    %c0_0 = arith.constant 0 : index
    %c0_1 = arith.constant 0 : index
    %0 = vector.load %arg2[%c0, %c0_0, %c0_1] : memref<1x3x512xf32, #tpu.memory_space<vmem>>, vector<1x3x512xf32>
    %c0_2 = arith.constant 0 : index
    %c0_3 = arith.constant 0 : index
    %c0_4 = arith.constant 0 : index
    %1 = vector.load %arg4[%c0_2, %c0_3, %c0_4] : memref<1x6x512xf32, #tpu.memory_space<vmem>>, vector<1x3x512xf32>
    tpu.vector_store %arg4[%c0_2, %c0_3, %c0_4], %0 {strides = array<i32>} : memref<1x6x512xf32, #tpu.memory_space<vmem>>, vector<1x3x512xf32>,
    %c0_5 = arith.constant 0 : index
    %c0_6 = arith.constant 0 : index
    %2 = vector.load %arg3[%c0_5, %c0_6] : memref<3x512xf32, #tpu.memory_space<vmem>>, vector<3x512xf32>
    %3 = vector.shape_cast %2 : vector<3x512xf32> to vector<1x3x512xf32>
    %c0_7 = arith.constant 0 : index
    %c3 = arith.constant 3 : index
    %c0_8 = arith.constant 0 : index
    %4 = vector.load %arg4[%c0_7, %c3, %c0_8] : memref<1x6x512xf32, #tpu.memory_space<vmem>>, vector<1x3x512xf32>
    tpu.vector_store %arg4[%c0_7, %c3, %c0_8], %3 {strides = array<i32>} : memref<1x6x512xf32, #tpu.memory_space<vmem>>, vector<1x3x512xf32>,
    return
  }
  func.func @transform_0(%arg0: i32, %arg1: i32) -> (i32, i32, i32) {
    %c0_i32 = arith.constant 0 : i32
    %c0_i32_0 = arith.constant 0 : i32
    return %arg1, %c0_i32, %arg0 : i32, i32, i32
  }
  func.func @transform_1(%arg0: i32, %arg1: i32) -> (i32, i32) {
    %c0_i32 = arith.constant 0 : i32
    %c0_i32_0 = arith.constant 0 : i32
    return %c0_i32, %arg0 : i32, i32
  }
  func.func @transform_2(%arg0: i32, %arg1: i32) -> (i32, i32, i32) {
    %c0_i32 = arith.constant 0 : i32
    %c0_i32_0 = arith.constant 0 : i32
    return %arg1, %c0_i32, %arg0 : i32, i32, i32
  }
}

</mosaic_0001>

<bundles_post_ra>
// kernel: tpu_custom_call.1
= control target key start
LH: loop header
LB: loop body
LE: loop exit
PB: predicated region body
PF: predicated region fallthrough
CT: control target
= control target key end

     0   :  { %s451_s9 = smov 0   ;;  %s453_s10 = smov 0   ;;  %s505_s0 = inlined_call_operand.vmem [shape: f32[2,3,1024], index: 0, kind: input, shape index: {}]   ;;  %s506_s1 = inlined_call_operand.vmem [shape: f32[3,1024], index: 1, kind: input, shape index: {}]   ;;  %s507_s2 = inlined_call_operand.vmem [shape: f32[2,6,1024], index: 2, kind: output, shape index: {}]  }
   0x1   :  { %s455_s11 = smov 0   ;;  %s457_s12 = smov 0  }
   0x2   :  { %s459_s13 = smov 0  }
   0x3 LB: > { %s21_s14 = sadd.s32 1, %s426_s11  ;;  %s24_s15 = sadd.s32 1, %s430_s12  ;;  %s434_s13 = sphi %s459_s13, %s12_s13   ;;  %s430_s12 = sphi %s457_s12, %s511_s12   ;;  %s426_s11 = sphi %s455_s11, %s510_s11   ;;  %s422_s10 = sphi %s453_s10, %s509_s10   ;;  %s418_s9 = sphi %s451_s9, %s508_s9  }
   0x4   : > { %p22_p0 = scmp.ge.s32.totalorder %s21_s14, 2  ;;  %p341_p1 = scmp.ge.s32.totalorder %s434_s13, 1 }
   0x5   : > { %p144_p2 = scmp.lt.s32.totalorder %s434_s13, 5 }
   0x6   : > { %s513_s14 = smov (%p22_p0, %s21_s14), 0  ;;  %s515_s15 = smov (!%p22_p0, %s24_s15), %s430_s12 }
   0x7   : > { %p145_p3 = pnand %p341_p1, %p144_p2  ;;  %p26_p4 = scmp.ge.s32.totalorder %s515_s15, 2 }
   0x8   : > { %s342_s16 = sshll.u32 (!%p145_p3), %s422_s10, 2  ;;  %p180_p5 = scmp.lt.s32.totalorder (!%p145_p3), %s418_s9, 1 }
   0x9   : > { %s517_s15 = smov (%p26_p4, %s515_s15), 0  ;;  %148 = sbr.rel (%p145_p3) target bundleno = 24 (0x18), region = 28 }
   0xa   : > { %p182_p6 = scmp.lt.s32.totalorder (!%p145_p3), %s342_s16, 7 }
   0xe   : > { %s519_s9 = smov (!%p180_p5, %s418_s9), 1  ;;  %s521_s16 = smov (!%p182_p6, %s342_s16), 7 }
   0xf   : > { %s343_s17 = sshll.u32 %s519_s9, 3  ;;  %s346_s19 = sshll.u32 %s521_s16, 2 }
  0x10   : > { %s185_s18 = sadd.s32 %s343_s17, %s521_s16  ;;  %s193_s30 = scalar_lea.vmem %s506_s1, %s346_s19 }
  0x11   : > { %s344_s20 = sshll.u32 %s185_s18, 2  ;;  %s349_s21 = sshll.u32 %s185_s18, 3  ;;  %v217_v4 = vld [vmem:[%s193_s30] sm:$0x77]  ;;  %v218_v5 = vld [vmem:[%s193_s30 + $0x8] sm:$0x77] }
  0x12   : > { %s187_s24 = scalar_lea.vmem %s505_s0, %s344_s20  ;;  %s203_s27 = scalar_lea.vmem %s507_s2, %s349_s21  ;;  %v223_v6 = vrot.slane %v217_v4, 5  ;;  %v221_v7 = vcombine.high %v217_v4, %v217_v4  ;;  %v225_v8 = vrot.slane %v218_v5, 5  ;;  %v222_v9 = vcombine.high %v218_v5, %v218_v5 }
  0x13   : > { %v205_v0 = vld [vmem:[%s187_s24] sm:$0x77]  ;;  %v206_v1 = vld [vmem:[%s187_s24 + $0x8] sm:$0x77] }
  0x14   : > { %213 = vst [vmem:[%s203_s27] sm:$0x7] %v205_v0  ;;  %v209_v2 = vcombine.high %v205_v0, %v205_v0  ;;  %215 = vst [vmem:[%s203_s27 + $0x10] sm:$0x7] %v206_v1  ;;  %v210_v3 = vcombine.high %v206_v1, %v206_v1  ;;  %v224_v10 = vrot.slane %v221_v7, 5  ;;  %v226_v11 = vrot.slane %v222_v9, 5 }
  0x15   : > { %231 = vst [vmem:[%s203_s27] sm:$0x38] %v223_v6  ;;  %233 = vst [vmem:[%s203_s27 + $0x10] sm:$0x38] %v225_v8 }
  0x16   : > { %214 = vst [vmem:[%s203_s27 + $0x8] sm:$0x7] %v209_v2  ;;  %216 = vst [vmem:[%s203_s27 + $0x18] sm:$0x7] %v210_v3 }
  0x17   : > { %232 = vst [vmem:[%s203_s27 + $0x8] sm:$0x38] %v224_v10  ;;  %234 = vst [vmem:[%s203_s27 + $0x18] sm:$0x38] %v226_v11 }
  0x18 PF: > { %s12_s13 = sadd.s32 1, %s434_s13   ;;  %s508_s9 = smov %s426_s11 }
  0x19   : > { %p9_p7 = scmp.ge.s32.totalorder %s12_s13, 6   ;;  %s509_s10 = smov %s430_s12 }
  0x1a   : > { %s510_s11 = smov %s513_s14  ;;  %s511_s12 = smov %s517_s15 }
  0x1b   :  { %11 = sbr.rel (!%p9_p7) target bundleno = 3 (0x3), region = 61 }

</bundles_post_ra>
